<compile_context>
chip_gen: v5e
topology: v5e:2x2
jax: 0.10.0
libtpu: 0.0.40
codegen_flags: <defaults>
</compile_context>

<pallas_src>
import functools

import numpy as np
import jax
import jax.numpy as jnp
from jax import lax
from jax.experimental import pallas as pl
from jax.experimental.pallas import tpu as pltpu


def _round_up(x, m):
    return (x + m - 1) // m * m


# --------------------------------------------------------------------------
# Kernel
# --------------------------------------------------------------------------
def _hgp_kernel(x_ref, w_ref, b_ref, mseg_ref, g_ref, out_ref, *, n_nodes):
    """One batch tile.

    x_ref:    (TILE_B, D)       flattened input features (f32, cast here)
    w_ref:    (D, K_pad)        packed conv weights (bf16), VMEM resident
    b_ref:    (1, K_pad)        packed biases (f32); padding lanes = -1e30
    mseg_ref: (K_pad, K_pad)    0/1 block-diagonal segment-sum matrix
    g_ref:    (K_pad, K_pad)    0/1 node-gate gather matrix
    out_ref:  (TILE_B, K_pad)   combined output:
              cols [0, n_nodes)                      -> node softmax
              cols [n_nodes, n_nodes+sum(leaf_nums)) -> gated leaf softmaxes
              cols [K, K_pad)                        -> zeros
    """
    # Cast to bf16 in-register (no wrapper-side HBM round trip); one MXU
    # matmul with f32 accumulation produces every node + leaf logit at once.
    x = x_ref[...].astype(w_ref.dtype)                                   # (TB, D)
    logits = (jnp.dot(x, w_ref[...], preferred_element_type=jnp.float32)
              + b_ref[...])                                              # (TB, Kp)

    # Collapsed epilogue: one shared row-max stabilizer (softmax is
    # shift-invariant per segment) and ONE exp over the lane-dense tile.
    # Padding lanes have bias -1e30, so their exp is exactly 0.
    m = jnp.max(logits, axis=-1, keepdims=True)
    e = jnp.exp(logits - m)                                              # f32

    # Per-segment softmax denominators broadcast back to every column with a
    # single static 0/1 block-diagonal matmul on the otherwise-idle MXU.
    # HIGHEST precision keeps the f32 exp values intact, so each segment's
    # probabilities sum to 1 to ~1e-6.
    denom = jnp.dot(e, mseg_ref[...], preferred_element_type=jnp.float32,
                    precision=lax.Precision.HIGHEST)
    probs = e / denom                         # node + leaf softmaxes (f32)

    # Node gate broadcast onto each leaf segment with a second static matmul
    # (gate[:, j] = node_prob[:, node_of(j)] for leaf columns, 0 elsewhere).
    gate = jnp.dot(probs, g_ref[...], preferred_element_type=jnp.float32,
                   precision=lax.Precision.HIGHEST)

    col = lax.broadcasted_iota(jnp.int32, probs.shape, 1)
    out = jnp.where(col < n_nodes, probs, probs * gate)
    out_ref[...] = out.astype(out_ref.dtype)


# --------------------------------------------------------------------------
# Parameter packing (done once; hoisted out of the per-call path)
# --------------------------------------------------------------------------
def pack_hgp_params(node_w, node_b, leaf_ws, leaf_bs, *,
                    matmul_dtype=jnp.bfloat16):
    """Pack all conv weights into one lane-padded (D, K_pad) matrix + bias,
    plus the static 0/1 segment-sum and gate-gather matrices."""
    n_nodes = int(node_w.shape[0])
    d = int(node_w.shape[1] * node_w.shape[2] * node_w.shape[3])
    leaf_nums = tuple(int(w.shape[0]) for w in leaf_ws)
    assert all(n > 0 for n in leaf_nums), "leaf_nums entries must be > 0"

    w_all = jnp.concatenate(
        [node_w.reshape(n_nodes, d)]
        + [w.reshape(w.shape[0], d) for w in leaf_ws], axis=0)      # (K, D)
    b_all = jnp.concatenate([node_b] + list(leaf_bs))               # (K,)

    k = int(w_all.shape[0])
    k_pad = _round_up(max(k, 128), 128)           # lane-dense output width

    w_packed = jnp.zeros((d, k_pad), dtype=matmul_dtype)
    w_packed = w_packed.at[:, :k].set(w_all.T.astype(matmul_dtype))
    # Padding lanes get a -1e30 bias so exp(pad_logit - row_max) is exactly 0
    # (no extra in-kernel masking select needed).
    b_packed = jnp.full((1, k_pad), -1e30, dtype=jnp.float32)
    b_packed = b_packed.at[:, :k].set(b_all.astype(jnp.float32))

    # Segment id per packed column: node cols -> 0, leaf segment i -> i+1.
    # Padding columns are tagged segment 0: their exp is exactly 0, so they
    # do not perturb the node denominator, and they never hit a 0/0.
    seg = np.zeros((k_pad,), np.int32)
    off = n_nodes
    for i, lf in enumerate(leaf_nums):
        seg[off:off + lf] = i + 1
        off += lf
    # denom = exp @ mseg broadcasts each segment's sum onto every column of
    # that segment (block-diagonal 0/1 matrix, one MXU matmul).
    mseg = (seg[:, None] == seg[None, :]).astype(np.float32)
    # gate = probs @ gmat puts node_prob[:, i] onto every column of leaf
    # segment i (zeros on node / padding columns).
    rows = np.arange(k_pad)
    gmat = ((rows[:, None] < n_nodes)
            & (seg[None, :] == rows[:, None] + 1)).astype(np.float32)
    return w_packed, b_packed, jnp.asarray(mseg), jnp.asarray(gmat)


# --------------------------------------------------------------------------
# Batch-tile selection (cross-generation VMEM budget)
# --------------------------------------------------------------------------
def _pick_tile_b(bs, d, k_pad):
    """Largest batch tile that fits a conservative cross-gen VMEM budget."""
    budget = 36 << 20                      # headroom inside the 48 MiB limit
    # Resident: bf16 weights (x2 default pipeline buffers) + bias + the two
    # (K_pad, K_pad) f32 segment matrices (x2 buffers).
    fixed = 2 * d * k_pad * 2 + 2 * (k_pad + 2 * k_pad * k_pad) * 4
    # Per row: f32 x tile x2 buffers + in-kernel bf16 copy, f32 out x2
    # buffers, ~5 f32 epilogue temporaries (logits/exp/denom/gate/out).
    per_row = d * (4 * 2 + 2) + k_pad * 4 * (2 + 5)
    # TODO(synk): if D grows so large that even tb=8 overflows this budget,
    # add a contraction grid axis over D with an f32 VMEM accumulator instead
    # of shrinking the batch tile further.
    tb = max((budget - fixed) // per_row, 8)
    tb = min(tb, 2048)
    tb -= tb % 8
    if bs <= tb:
        if bs >= 16:
            # Split into >= 2 grid steps so both v7x TensorCores get work.
            tb = _round_up(-(-bs // 2), 8)
        else:
            tb = bs        # block == full batch dim (allowed by tiling rules)
    return int(tb)


# --------------------------------------------------------------------------
# Forward wrapper
# --------------------------------------------------------------------------
@functools.partial(jax.jit, static_argnames=("leaf_nums",))
def hgp_forward(x_nchw, w_packed, b_packed, mseg, gmat, *, leaf_nums):
    """Returns (node_pred (bs, n_nodes), leaf_preds (bs, sum(leaf_nums)))."""
    leaf_nums = tuple(int(n) for n in leaf_nums)
    n_nodes = len(leaf_nums)
    total_leaves = int(sum(leaf_nums))

    bs = int(x_nchw.shape[0])
    d = int(x_nchw.shape[1] * x_nchw.shape[2] * x_nchw.shape[3])
    k_pad = int(w_packed.shape[1])

    # Flatten NCHW -> (bs, C*H*W); matches Conv2d (O, C, kh, kw) flattening.
    # No dtype cast and no padded copy here: x stays f32 in HBM, is cast to
    # bf16 inside the kernel, and ragged batch tiles are handled by the
    # pl.cdiv grid (Pallas pads partial blocks; OOB rows are never written).
    x_flat = x_nchw.reshape(bs, d)

    tb = _pick_tile_b(bs, d, k_pad)
    grid = (pl.cdiv(bs, tb),)

    cost = pl.CostEstimate(
        flops=2 * bs * d * k_pad + 2 * (2 * bs * k_pad * k_pad),
        transcendentals=bs * k_pad,                        # single exp pass
        bytes_accessed=(bs * d * x_flat.dtype.itemsize     # x read once (f32)
                        + d * k_pad * w_packed.dtype.itemsize
                        + 2 * k_pad * k_pad * 4 + k_pad * 4
                        + bs * k_pad * 4),                 # combined f32 out
    )

    kernel = functools.partial(_hgp_kernel, n_nodes=n_nodes)

    combined = pl.pallas_call(
        kernel,
        out_shape=jax.ShapeDtypeStruct((bs, k_pad), jnp.float32),
        grid=grid,
        in_specs=[
            pl.BlockSpec((tb, d), lambda i: (i, 0)),         # x streamed per tile
            pl.BlockSpec((d, k_pad), lambda i: (0, 0)),      # resident weights
            pl.BlockSpec((1, k_pad), lambda i: (0, 0)),      # resident bias
            pl.BlockSpec((k_pad, k_pad), lambda i: (0, 0)),  # segment-sum matrix
            pl.BlockSpec((k_pad, k_pad), lambda i: (0, 0)),  # gate gather matrix
        ],
        out_specs=pl.BlockSpec((tb, k_pad), lambda i: (i, 0)),
        compiler_params=pltpu.CompilerParams(
            dimension_semantics=("parallel",),     # megacore / v7x 2-TC sharding
            vmem_limit_bytes=48 * 1024 * 1024,     # > v5e 16 MiB scoped default,
                                                   # < v7x 64 MiB physical VMEM
        ),
        cost_estimate=cost,
    )(x_flat, w_packed, b_packed, mseg, gmat)

    node_pred = combined[:, :n_nodes]
    leaf_preds = combined[:, n_nodes:n_nodes + total_leaves]
    return node_pred, leaf_preds


# --------------------------------------------------------------------------
# Pure-JAX reference (same bf16 input/weight quantization as the kernel)
# --------------------------------------------------------------------------
def _reference(x_nchw, node_w, node_b, leaf_ws, leaf_bs, leaf_nums,
               matmul_dtype=jnp.bfloat16):
    bs = x_nchw.shape[0]
    d = x_nchw.shape[1] * x_nchw.shape[2] * x_nchw.shape[3]
    q = lambda a: a.astype(matmul_dtype).astype(jnp.float32)
    xf = q(x_nchw.reshape(bs, d))
    node_logits = xf @ q(node_w.reshape(len(leaf_nums), d)).T + node_b
    node_pred = jax.nn.softmax(node_logits, axis=-1)
    parts = []
    for i, (w, b) in enumerate(zip(leaf_ws, leaf_bs)):
        logit = xf @ q(w.reshape(w.shape[0], d)).T + b
        parts.append(jax.nn.softmax(logit, axis=-1) * node_pred[:, i][:, None])
    return node_pred, jnp.concatenate(parts, axis=-1)


if __name__ == "__main__":
    batch = 2
    feature_dim = 4
    fmap_size = 16
    leaf_nums = (3, 4, 5)
    n_nodes = len(leaf_nums)

    key = jax.random.PRNGKey(0)
    keys = jax.random.split(key, 3 + 2 * len(leaf_nums))

    x = jax.random.normal(keys[0], (batch, feature_dim, fmap_size, fmap_size),
                          dtype=jnp.float32)

    # Deterministic synthetic parameters (shapes match nn.Conv2d weights/biases).
    scale = 1.0 / (feature_dim * fmap_size * fmap_size) ** 0.5
    node_w = scale * jax.random.normal(
        keys[1], (n_nodes, feature_dim, fmap_size, fmap_size), dtype=jnp.float32)
    node_b = scale * jax.random.normal(keys[2], (n_nodes,), dtype=jnp.float32)
    leaf_ws, leaf_bs = [], []
    for i, lf_n in enumerate(leaf_nums):
        leaf_ws.append(scale * jax.random.normal(
            keys[3 + 2 * i], (lf_n, feature_dim, fmap_size, fmap_size),
            dtype=jnp.float32))
        leaf_bs.append(scale * jax.random.normal(
            keys[4 + 2 * i], (lf_n,), dtype=jnp.float32))

    # Pack weights + static segment matrices once (out of the per-call path).
    params = pack_hgp_params(node_w, node_b, leaf_ws, leaf_bs)

    node_pred, leaf_preds = hgp_forward(x, *params, leaf_nums=leaf_nums)
    jax.block_until_ready((node_pred, leaf_preds))

    # Correctness vs a reference with the same bf16 input/weight quantization.
    ref_node, ref_leaf = _reference(x, node_w, node_b, leaf_ws, leaf_bs,
                                    leaf_nums)
    assert node_pred.shape == (batch, n_nodes)
    assert leaf_preds.shape == (batch, sum(leaf_nums))
    assert jnp.allclose(node_pred, ref_node, atol=2e-3, rtol=2e-3), (
        float(jnp.max(jnp.abs(node_pred - ref_node))))
    assert jnp.allclose(leaf_preds, ref_leaf, atol=2e-3, rtol=2e-3), (
        float(jnp.max(jnp.abs(leaf_preds - ref_leaf))))
    assert jnp.allclose(jnp.sum(node_pred, axis=-1), 1.0, atol=2e-3), (
        float(jnp.max(jnp.abs(jnp.sum(node_pred, axis=-1) - 1.0))))

    print("KERNEL_OK")
</pallas_src>

<mosaic_0001>
module attributes {stable_mosaic.version = 11 : i64} {
  func.func @_hgp_kernel(%arg0: i32, %arg1: memref<2x1024xf32, #tpu.memory_space<vmem>>, %arg2: memref<1024x128xbf16, #tpu.memory_space<vmem>>, %arg3: memref<1x128xf32, #tpu.memory_space<vmem>>, %arg4: memref<128x128xf32, #tpu.memory_space<vmem>>, %arg5: memref<128x128xf32, #tpu.memory_space<vmem>>, %arg6: memref<2x128xf32, #tpu.memory_space<vmem>>) attributes {dimension_semantics = [#tpu.dimension_semantics<parallel>], iteration_bounds = array<i64: 1>, scalar_prefetch = 0 : i64, scratch_operands = 0 : i64, tpu.core_type = #tpu.core_type<tc>, window_params = [{transform_indices = @transform_0, window_bounds = array<i64: 2, 1024>}, {pipeline_mode = #tpu.pipeline_mode<synchronous>, transform_indices = @transform_1, window_bounds = array<i64: 1024, 128>}, {pipeline_mode = #tpu.pipeline_mode<synchronous>, transform_indices = @transform_2, window_bounds = array<i64: 1, 128>}, {pipeline_mode = #tpu.pipeline_mode<synchronous>, transform_indices = @transform_3, window_bounds = array<i64: 128, 128>}, {pipeline_mode = #tpu.pipeline_mode<synchronous>, transform_indices = @transform_4, window_bounds = array<i64: 128, 128>}, {transform_indices = @transform_5, window_bounds = array<i64: 2, 128>}]} {
    %c0 = arith.constant 0 : index
    %c0_0 = arith.constant 0 : index
    %0 = vector.load %arg1[%c0, %c0_0] : memref<2x1024xf32, #tpu.memory_space<vmem>>, vector<2x1024xf32>
    %1 = arith.truncf %0 : vector<2x1024xf32> to vector<2x1024xbf16>
    %c0_1 = arith.constant 0 : index
    %c0_2 = arith.constant 0 : index
    %2 = vector.load %arg2[%c0_1, %c0_2] : memref<1024x128xbf16, #tpu.memory_space<vmem>>, vector<1024x128xbf16>
    %cst = arith.constant dense<0.000000e+00> : vector<2x128xf32>
    %3 = tpu.matmul %1, %2, %cst {dimension_numbers = #tpu.dot_dimension_numbers<[1], [0], [0], [1], [0, 0, 1, 1], [], []>} : vector<2x1024xbf16>, vector<1024x128xbf16>, vector<2x128xf32> -> vector<2x128xf32>
    %c0_3 = arith.constant 0 : index
    %c0_4 = arith.constant 0 : index
    %4 = vector.load %arg3[%c0_3, %c0_4] : memref<1x128xf32, #tpu.memory_space<vmem>>, vector<1x128xf32>
    %5 = vector.broadcast %4 : vector<1x128xf32> to vector<2x128xf32>
    %6 = arith.addf %3, %5 : vector<2x128xf32>
    %cst_5 = arith.constant dense<0xFF800000> : vector<2xf32>
    %7 = vector.multi_reduction <maximumf>, %6, %cst_5 [1] : vector<2x128xf32> to vector<2xf32>
    %8 = vector.shape_cast %7 : vector<2xf32> to vector<2x1xf32>
    %9 = vector.broadcast %8 : vector<2x1xf32> to vector<2x128xf32>
    %10 = arith.subf %6, %9 : vector<2x128xf32>
    %11 = math.exp %10 : vector<2x128xf32>
    %c0_6 = arith.constant 0 : index
    %c0_7 = arith.constant 0 : index
    %12 = vector.load %arg4[%c0_6, %c0_7] : memref<128x128xf32, #tpu.memory_space<vmem>>, vector<128x128xf32>
    %cst_8 = arith.constant dense<0.000000e+00> : vector<2x128xf32>
    %13 = tpu.matmul %11, %12, %cst_8 {dimension_numbers = #tpu.dot_dimension_numbers<[1], [0], [0], [1], [0, 0, 1, 1], [], []>, precision = #tpu.contract_precision<fp32>} : vector<2x128xf32>, vector<128x128xf32>, vector<2x128xf32> -> vector<2x128xf32>
    %14 = arith.divf %11, %13 : vector<2x128xf32>
    %c0_9 = arith.constant 0 : index
    %c0_10 = arith.constant 0 : index
    %15 = vector.load %arg5[%c0_9, %c0_10] : memref<128x128xf32, #tpu.memory_space<vmem>>, vector<128x128xf32>
    %cst_11 = arith.constant dense<0.000000e+00> : vector<2x128xf32>
    %16 = tpu.matmul %14, %15, %cst_11 {dimension_numbers = #tpu.dot_dimension_numbers<[1], [0], [0], [1], [0, 0, 1, 1], [], []>, precision = #tpu.contract_precision<fp32>} : vector<2x128xf32>, vector<128x128xf32>, vector<2x128xf32> -> vector<2x128xf32>
    %17 = tpu.iota {dimensions = array<i32: 1>} : vector<2x128xi32>
    %c3_i32 = arith.constant 3 : i32
    %18 = vector.broadcast %c3_i32 : i32 to vector<2x128xi32>
    %19 = arith.cmpi slt, %17, %18 : vector<2x128xi32>
    %20 = arith.mulf %14, %16 : vector<2x128xf32>
    %21 = arith.select %19, %14, %20 : vector<2x128xi1>, vector<2x128xf32>
    %c0_12 = arith.constant 0 : index
    %c0_13 = arith.constant 0 : index
    %22 = vector.load %arg6[%c0_12, %c0_13] : memref<2x128xf32, #tpu.memory_space<vmem>>, vector<2x128xf32>
    tpu.vector_store %arg6[%c0_12, %c0_13], %21 {strides = array<i32>} : memref<2x128xf32, #tpu.memory_space<vmem>>, vector<2x128xf32>,
    return
  }
  func.func @transform_0(%arg0: i32) -> (i32, i32) {
    %c0_i32 = arith.constant 0 : i32
    %c0_i32_0 = arith.constant 0 : i32
    return %arg0, %c0_i32 : i32, i32
  }
  func.func @transform_1(%arg0: i32) -> (i32, i32) {
    %c0_i32 = arith.constant 0 : i32
    %c0_i32_0 = arith.constant 0 : i32
    %c0_i32_1 = arith.constant 0 : i32
    return %c0_i32, %c0_i32_0 : i32, i32
  }
  func.func @transform_2(%arg0: i32) -> (i32, i32) {
    %c0_i32 = arith.constant 0 : i32
    %c0_i32_0 = arith.constant 0 : i32
    %c0_i32_1 = arith.constant 0 : i32
    return %c0_i32, %c0_i32_0 : i32, i32
  }
  func.func @transform_3(%arg0: i32) -> (i32, i32) {
    %c0_i32 = arith.constant 0 : i32
    %c0_i32_0 = arith.constant 0 : i32
    %c0_i32_1 = arith.constant 0 : i32
    return %c0_i32, %c0_i32_0 : i32, i32
  }
  func.func @transform_4(%arg0: i32) -> (i32, i32) {
    %c0_i32 = arith.constant 0 : i32
    %c0_i32_0 = arith.constant 0 : i32
    %c0_i32_1 = arith.constant 0 : i32
    return %c0_i32, %c0_i32_0 : i32, i32
  }
  func.func @transform_5(%arg0: i32) -> (i32, i32) {
    %c0_i32 = arith.constant 0 : i32
    %c0_i32_0 = arith.constant 0 : i32
    return %arg0, %c0_i32 : i32, i32
  }
}

</mosaic_0001>

<bundles_post_ra>
// kernel: hgp_forward.1
= control target key start
LH: loop header
LB: loop body
LE: loop exit
PB: predicated region body
PF: predicated region fallthrough
CT: control target
= control target key end

     0   :  { %10 = vsyncpa [#allocation3], 0  ;;  %s2392_s0 = inlined_call_operand.vmem [shape: f32[2,1024], index: 0, kind: input, shape index: {}]   ;;  %s2393_s1 = inlined_call_operand.hbm [shape: bf16[1024,128], index: 1, kind: input, shape index: {}]   ;;  %s2394_s2 = inlined_call_operand.vmem [shape: f32[1,128], index: 2, kind: input, shape index: {}]   ;;  %s2395_s3 = inlined_call_operand.vmem [shape: f32[128,128], index: 3, kind: input, shape index: {}]   ;;  %s2396_s4 = inlined_call_operand.hbm [shape: f32[128,128], index: 4, kind: input, shape index: {}]   ;;  %s2397_s5 = inlined_call_operand.vmem [shape: f32[2,128], index: 5, kind: output, shape index: {}]  }
   0x1   :  { %s18_s20 = sshll.u32 %s2393_s1, 4  ;;  %s19_s20 = int_to_ptr.hbm [resolvable:$true] %s18_s20 }
   0x2   :  { %11 = vsyncpa [#allocation5], 0  ;;  %s1834_s21 = smov [#allocation2]   ;;  %s35_s25 = sshll.u32 %s2396_s4, 4  ;;  %s36_s25 = int_to_ptr.hbm [resolvable:$true] %s35_s25 }
   0x3   :  { %s20_s22 = sshll.u32 %s1834_s21, 4  ;;  %s1835_s26 = smov 64   ;;  %s21_s22 = int_to_ptr.vmem [resolvable:$true] %s20_s22 }
   0x4   :  { %s1836_s27 = smov 4   ;;  %s1837_s28 = smov [#allocation4]  }
   0x5   :  { %26 = dma.hbm_to_vmem [thread:$0]  %s19_s20, 8192, %s21_s22, [#allocation3], %s1835_s26, %s1835_s26, %s1836_s27  }
   0x6   :  { %s37_s29 = sshll.u32 %s1837_s28, 4  ;;  %s1838_s30 = smov 128   ;;  %s38_s29 = int_to_ptr.vmem [resolvable:$true] %s37_s29 }
   0x7   :  { %s1839_s6 = smov 8  }
   0x8   :  { %43 = dma.hbm_to_vmem [thread:$0]  %s36_s25, 2048, %s38_s29, [#allocation5], %s1838_s30, %s1838_s30, %s1839_s6  }
   0x9   :  { %1830 = dma.done.wait [#allocation3], 8192  }
   0xa   :  { %1831 = vsyncadd [#allocation3], 4294959104 }
   0xb   :  { %1832 = dma.done.wait [#allocation5], 2048  }
   0xc   :  { %1833 = vsyncadd [#allocation5], 4294965248  ;;  %v1714_v0 = vld [vmem:[#allocation2 + $0x38] sm:$0xff]  ;;  %v1713_v4 = vld [vmem:[#allocation2 + $0x30] sm:$0xff]  ;;  %vm703_vm0 = vcmask 1041408  }
   0xd   :  { %v1722_v1 = vld [vmem:[#allocation2 + $0x78] sm:$0xff]  ;;  %599 = vmatpush.bf16.msra.mxu0 %v1714_v0  ;;  %v1721_v5 = vld [vmem:[#allocation2 + $0x70] sm:$0xff]  ;;  %v1712_v8 = vld [vmem:[#allocation2 + $0x28] sm:$0xff] }
   0xe   :  { %v1730_v2 = vld [vmem:[#allocation2 + $0xb8] sm:$0xff]  ;;  %612 = vmatpush.bf16.msra.mxu1 %v1722_v1  ;;  %v1729_v6 = vld [vmem:[#allocation2 + $0xb0] sm:$0xff]  ;;  %v1720_v9 = vld [vmem:[#allocation2 + $0x68] sm:$0xff] }
   0xf   :  { %v1738_v3 = vld [vmem:[#allocation2 + $0xf8] sm:$0xff]  ;;  %625 = vmatpush.bf16.msra.mxu2 %v1730_v2  ;;  %v1737_v7 = vld [vmem:[#allocation2 + $0xf0] sm:$0xff]  ;;  %v1728_v10 = vld [vmem:[#allocation2 + $0xa8] sm:$0xff] }
  0x10   :  { %638 = vmatpush.bf16.msra.mxu3 %v1738_v3  ;;  %v1736_v11 = vld [vmem:[#allocation2 + $0xe8] sm:$0xff]  ;;  %v1711_v12 = vld [vmem:[#allocation2 + $0x20] sm:$0xff]  ;;  %v52_v16 = vld [vmem:[%s2392_s0] sm:$0xff] }
  0x11   :  { %600 = vmatpush.bf16.msra.mxu0 %v1713_v4  ;;  %v1719_v13 = vld [vmem:[#allocation2 + $0x60] sm:$0xff]  ;;  %v1710_v17 = vld [vmem:[#allocation2 + $0x18] sm:$0xff]  ;;  %56 = vst [vmem:[#allocation1] ss:$4 sm:$0xff] %v52_v16  ;;  %v1709_v21 = vld [vmem:[#allocation2 + $0x10] sm:$0xff] }
  0x12   :  { %613 = vmatpush.bf16.msra.mxu1 %v1721_v5  ;;  %v1727_v14 = vld [vmem:[#allocation2 + $0xa0] sm:$0xff]  ;;  %v1718_v18 = vld [vmem:[#allocation2 + $0x58] sm:$0xff]  ;;  %v1717_v22 = vld [vmem:[#allocation2 + $0x50] sm:$0xff] }
  0x13   :  { %626 = vmatpush.bf16.msra.mxu2 %v1729_v6  ;;  %v1735_v15 = vld [vmem:[#allocation2 + $0xe0] sm:$0xff]  ;;  %v1726_v19 = vld [vmem:[#allocation2 + $0x98] sm:$0xff]  ;;  %v1725_v23 = vld [vmem:[#allocation2 + $0x90] sm:$0xff] }
  0x14   :  { %639 = vmatpush.bf16.msra.mxu3 %v1737_v7  ;;  %v1734_v20 = vld [vmem:[#allocation2 + $0xd8] sm:$0xff]  ;;  %v1733_v24 = vld [vmem:[#allocation2 + $0xd0] sm:$0xff]  ;;  %v1708_v25 = vld [vmem:[#allocation2 + $0x8] sm:$0xff] }
  0x15   :  { %601 = vmatpush.bf16.msra.mxu0 %v1712_v8  ;;  %v1716_v26 = vld [vmem:[#allocation2 + $0x48] sm:$0xff]  ;;  %v53_v29 = vld [vmem:[%s2392_s0 + $0x8] sm:$0xff]  ;;  %v1746_v34 = vld [vmem:[#allocation2 + $0x138] sm:$0xff] }
  0x16   :  { %614 = vmatpush.bf16.msra.mxu1 %v1720_v9  ;;  %v1724_v27 = vld [vmem:[#allocation2 + $0x88] sm:$0xff]  ;;  %v1707_v30 = vld [vmem:[#allocation2] sm:$0xff]  ;;  %58 = vst [vmem:[#allocation1 + $0x20] ss:$4 sm:$0xff] %v53_v29  ;;  %v1754_v35 = vld [vmem:[#allocation2 + $0x178] sm:$0xff] }
  0x17   :  { %627 = vmatpush.bf16.msra.mxu2 %v1728_v10  ;;  %v1732_v28 = vld [vmem:[#allocation2 + $0xc8] sm:$0xff]  ;;  %v1715_v31 = vld [vmem:[#allocation2 + $0x40] sm:$0xff]  ;;  %v1762_v40 = vld [vmem:[#allocation2 + $0x1b8] sm:$0xff] }
  0x18   :  { %640 = vmatpush.bf16.msra.mxu3 %v1736_v11  ;;  %v1723_v32 = vld [vmem:[#allocation2 + $0x80] sm:$0xff]  ;;  %v61_v36 = vld.sshfl [vmem:[#allocation1 + $0x10] sm:$0xff pattern:$0x73625140]  ;;  %v1770_v41 = vld [vmem:[#allocation2 + $0x1f8] sm:$0xff] }
  0x19   :  { %602 = vmatpush.bf16.msra.mxu0 %v1711_v12  ;;  %v1731_v33 = vld [vmem:[#allocation2 + $0xc0] sm:$0xff]  ;;  %v59_v37 = vld.sshfl [vmem:[#allocation1] sm:$0xff pattern:$0x73625140]  ;;  %v77_v42 = vpack.c.bf16 %v61_v36, %v61_v36  ;;  %v1745_v46 = vld [vmem:[#allocation2 + $0x130] sm:$0xff] }
  0x1a   :  { %615 = vmatpush.bf16.msra.mxu1 %v1719_v13  ;;  %v62_v38 = vld.sshfl [vmem:[#allocation1 + $0x18] sm:$0xff pattern:$0x73625140]  ;;  %v60_v39 = vld.sshfl [vmem:[#allocation1 + $0x8] sm:$0xff pattern:$0x73625140]  ;;  %v75_v43 = vpack.c.bf16 %v59_v37, %v59_v37 }
  0x1b   :  { %628 = vmatpush.bf16.msra.mxu2 %v1727_v14  ;;  %v78_v44 = vpack.c.bf16 %v62_v38, %v62_v38  ;;  %v76_v45 = vpack.c.bf16 %v60_v39, %v60_v39  ;;  %v1753_v47 = vld [vmem:[#allocation2 + $0x170] sm:$0xff]  ;;  %v1744_v50 = vld [vmem:[#allocation2 + $0x128] sm:$0xff]  ;;  %v1743_v54 = vld [vmem:[#allocation2 + $0x120] sm:$0xff] }
  0x1c   :  { %641 = vmatpush.bf16.msra.mxu3 %v1735_v15  ;;  %v1761_v48 = vld [vmem:[#allocation2 + $0x1b0] sm:$0xff]  ;;  %v1752_v51 = vld [vmem:[#allocation2 + $0x168] sm:$0xff]  ;;  %v1751_v55 = vld [vmem:[#allocation2 + $0x160] sm:$0xff] }
  0x1d   :  { %603 = vmatpush.bf16.msra.mxu0 %v1710_v17  ;;  %v1769_v49 = vld [vmem:[#allocation2 + $0x1f0] sm:$0xff]  ;;  %v1760_v52 = vld [vmem:[#allocation2 + $0x1a8] sm:$0xff]  ;;  %v1759_v56 = vld [vmem:[#allocation2 + $0x1a0] sm:$0xff] }
  0x1e   :  { %616 = vmatpush.bf16.msra.mxu1 %v1718_v18  ;;  %v1768_v53 = vld [vmem:[#allocation2 + $0x1e8] sm:$0xff]  ;;  %v1767_v57 = vld [vmem:[#allocation2 + $0x1e0] sm:$0xff]  ;;  %v1742_v58 = vld [vmem:[#allocation2 + $0x118] sm:$0xff] }
  0x1f   :  { %629 = vmatpush.bf16.msra.mxu2 %v1726_v19  ;;  %v1750_v59 = vld [vmem:[#allocation2 + $0x158] sm:$0xff]  ;;  %v1741_v62 = vld [vmem:[#allocation2 + $0x110] sm:$0xff]  ;;  %v1740_v2 = vld [vmem:[#allocation2 + $0x108] sm:$0xff] }
  0x20   :  { %642 = vmatpush.bf16.msra.mxu3 %v1734_v20  ;;  %v1758_v60 = vld [vmem:[#allocation2 + $0x198] sm:$0xff]  ;;  %v1749_v63 = vld [vmem:[#allocation2 + $0x150] sm:$0xff]  ;;  %v1748_v3 = vld [vmem:[#allocation2 + $0x148] sm:$0xff] }
  0x21   :  { %604 = vmatpush.bf16.msra.mxu0 %v1709_v21  ;;  %v1766_v61 = vld [vmem:[#allocation2 + $0x1d8] sm:$0xff]  ;;  %v1757_v0 = vld [vmem:[#allocation2 + $0x190] sm:$0xff]  ;;  %v1756_v4 = vld [vmem:[#allocation2 + $0x188] sm:$0xff] }
  0x22   :  { %617 = vmatpush.bf16.msra.mxu1 %v1717_v22  ;;  %v1765_v1 = vld [vmem:[#allocation2 + $0x1d0] sm:$0xff]  ;;  %v1764_v5 = vld [vmem:[#allocation2 + $0x1c8] sm:$0xff]  ;;  %v1739_v6 = vld [vmem:[#allocation2 + $0x100] sm:$0xff] }
  0x23   :  { %630 = vmatpush.bf16.msra.mxu2 %v1725_v23  ;;  %v1747_v7 = vld [vmem:[#allocation2 + $0x140] sm:$0xff]  ;;  %v63_v10 = vld.sshfl [vmem:[#allocation1 + $0x20] sm:$0xff pattern:$0x73625140] }
  0x24   :  { %643 = vmatpush.bf16.msra.mxu3 %v1733_v24  ;;  %v1755_v8 = vld [vmem:[#allocation2 + $0x180] sm:$0xff]  ;;  %v65_v12 = vld.sshfl [vmem:[#allocation1 + $0x30] sm:$0xff pattern:$0x73625140]  ;;  %v79_v14 = vpack.c.bf16 %v63_v10, %v63_v10  ;;  %v1777_v24 = vld [vmem:[%s2394_s2] ss:$0 sm:$0xff] }
  0x25   :  { %605 = vmatpush.bf16.msra.mxu0 %v1708_v25  ;;  %v1763_v9 = vld [vmem:[#allocation2 + $0x1c0] sm:$0xff]  ;;  %v66_v13 = vld.sshfl [vmem:[#allocation1 + $0x38] sm:$0xff pattern:$0x73625140]  ;;  %v81_v16 = vpack.c.bf16 %v65_v12, %v65_v12 }
  0x26   :  { %618 = vmatpush.bf16.msra.mxu1 %v1716_v26  ;;  %v64_v11 = vld.sshfl [vmem:[#allocation1 + $0x28] sm:$0xff pattern:$0x73625140]  ;;  %v82_v17 = vpack.c.bf16 %v66_v13, %v66_v13  ;;  %v725_v25 = vld [vmem:[%s2395_s3 + $0x78] sm:$0xff]  ;;  %v724_v26 = vld [vmem:[%s2395_s3 + $0x70] sm:$0xff] }
  0x27   :  { %631 = vmatpush.bf16.msra.mxu2 %v1724_v27  ;;  %v80_v15 = vpack.c.bf16 %v64_v11, %v64_v11  ;;  %v723_v27 = vld [vmem:[%s2395_s3 + $0x68] sm:$0xff]  ;;  %v1900_v29 = vand.u32 4294901760, %v724_v26 }
  0x28   :  { %644 = vmatpush.bf16.msra.mxu3 %v1732_v28  ;;  %v1898_v28 = vand.u32 4294901760, %v725_v25  ;;  %v719_v39 = vld [vmem:[%s2395_s3 + $0x48] sm:$0xff] }
  0x29   :  { %606 = vmatpush.bf16.msra.mxu0 %v1707_v30  ;;  %v1902_v30 = vand.u32 4294901760, %v723_v27 }
  0x2a   :  { %619 = vmatpush.bf16.msra.mxu1 %v1715_v31  ;;  %v722_v31 = vld [vmem:[%s2395_s3 + $0x60] sm:$0xff] }
  0x2b   :  { %632 = vmatpush.bf16.msra.mxu2 %v1723_v32  ;;  %v721_v32 = vld [vmem:[%s2395_s3 + $0x58] sm:$0xff]  ;;  %v1913_v36 = vand.u32 4294901760, %v722_v31 }
  0x2c   :  { %645 = vmatpush.bf16.msra.mxu3 %v1731_v33  ;;  %607 = vmatmul.bf16.vlgmr.msra.gmra.mxu0 %v75_v43  ;;  %v720_v33 = vld [vmem:[%s2395_s3 + $0x50] sm:$0xff]  ;;  %v1915_v37 = vand.u32 4294901760, %v721_v32  ;;  %v1929_v43 = vsub.f32 %v724_v26, %v1900_v29  ;;  %v711_v26 = vld [vmem:[%s2395_s3 + $0x8] sm:$0xff] }
  0x2d   :  { %651 = vmatpush.bf16.msrb.mxu0 %v1746_v34  ;;  %620 = vmatmul.bf16.vlgmr.msra.gmra.mxu1 %v76_v45  ;;  %v1917_v38 = vand.u32 4294901760, %v720_v33  ;;  %v1935_v45 = vand.u32 4294901760, %v719_v39 }
  0x2e   :  { %664 = vmatpush.bf16.msrb.mxu1 %v1754_v35  ;;  %633 = vmatmul.bf16.vlgmr.msra.gmra.mxu2 %v77_v42  ;;  %v1926_v42 = vsub.f32 %v725_v25, %v1898_v28 }
  0x2f   :  { %677 = vmatpush.bf16.msrb.mxu2 %v1762_v40  ;;  %646 = vmatmul.bf16.vlgmr.msra.gmra.mxu3 %v78_v44  ;;  %v718_v40 = vld [vmem:[%s2395_s3 + $0x40] sm:$0xff]  ;;  %v1932_v44 = vsub.f32 %v723_v27, %v1902_v30 }
  0x30   :  { %690 = vmatpush.bf16.msrb.mxu3 %v1770_v41 }
  0x31   :  { %652 = vmatpush.bf16.msrb.mxu0 %v1745_v46  ;;  %v1939_v46 = vsub.f32 %v722_v31, %v1913_v36 }
  0x32   :  { %665 = vmatpush.bf16.msrb.mxu1 %v1753_v47  ;;  %v1942_v47 = vsub.f32 %v721_v32, %v1915_v37 }
  0x33   :  { %678 = vmatpush.bf16.msrb.mxu2 %v1761_v48  ;;  %v1945_v48 = vsub.f32 %v720_v33, %v1917_v38 }
  0x34   :  { %691 = vmatpush.bf16.msrb.mxu3 %v1769_v49  ;;  %v1947_v49 = vand.u32 4294901760, %v718_v40 }
  0x35   :  { %653 = vmatpush.bf16.msrb.mxu0 %v1744_v50  ;;  %v769_v50 = vand.u32 4294901760, %v1926_v42 }
  0x36   :  { %666 = vmatpush.bf16.msrb.mxu1 %v1752_v51  ;;  %v775_v51 = vand.u32 4294901760, %v1929_v43 }
  0x37   :  { %679 = vmatpush.bf16.msrb.mxu2 %v1760_v52  ;;  %v781_v52 = vand.u32 4294901760, %v1932_v44 }
  0x38   :  { %692 = vmatpush.bf16.msrb.mxu3 %v1768_v53  ;;  %v787_v53 = vand.u32 4294901760, %v1939_v46 }
  0x39   :  { %654 = vmatpush.bf16.msrb.mxu0 %v1743_v54  ;;  %v793_v54 = vand.u32 4294901760, %v1942_v47 }
  0x3a   :  { %667 = vmatpush.bf16.msrb.mxu1 %v1751_v55  ;;  %v1957_v55 = vsub.f32 %v719_v39, %v1935_v45 }
  0x3b   :  { %680 = vmatpush.bf16.msrb.mxu2 %v1759_v56  ;;  %v770_v56 = vsub.f32 %v1926_v42, %v769_v50 }
  0x3c   :  { %693 = vmatpush.bf16.msrb.mxu3 %v1767_v57  ;;  %v776_v57 = vsub.f32 %v1929_v43, %v775_v51 }
  0x3d   :  { %655 = vmatpush.bf16.msrb.mxu0 %v1742_v58  ;;  %v782_v58 = vsub.f32 %v1932_v44, %v781_v52 }
  0x3e   :  { %668 = vmatpush.bf16.msrb.mxu1 %v1750_v59 }
  0x3f   :  { %681 = vmatpush.bf16.msrb.mxu2 %v1758_v60  ;;  %v799_v60 = vand.u32 4294901760, %v1945_v48 }
  0x40   :  { %694 = vmatpush.bf16.msrb.mxu3 %v1766_v61  ;;  %v1973_v61 = vsub.f32 %v718_v40, %v1947_v49 }
  0x41   :  { %656 = vmatpush.bf16.msrb.mxu0 %v1741_v62  ;;  %v717_v62 = vld [vmem:[%s2395_s3 + $0x38] sm:$0xff]  ;;  %v800_v12 = vsub.f32 %v1945_v48, %v799_v60 }
  0x42   :  { %669 = vmatpush.bf16.msrb.mxu1 %v1749_v63  ;;  %v716_v63 = vld [vmem:[%s2395_s3 + $0x30] sm:$0xff]  ;;  %v811_v13 = vand.u32 4294901760, %v1973_v61 }
  0x43   :  { %682 = vmatpush.bf16.msrb.mxu2 %v1757_v0  ;;  %v715_v0 = vld [vmem:[%s2395_s3 + $0x28] sm:$0xff] }
  0x44   :  { %695 = vmatpush.bf16.msrb.mxu3 %v1765_v1  ;;  %v771_v1 = vand.u32 4294901760, %v770_v56  ;;  %v2003_v10 = vand.u32 4294901760, %v715_v0  ;;  %v710_v56 = vld [vmem:[%s2395_s3] sm:$0xff] }
  0x45   :  { %657 = vmatpush.bf16.msrb.mxu0 %v1740_v2  ;;  %v777_v2 = vand.u32 4294901760, %v776_v57 }
  0x46   :  { %670 = vmatpush.bf16.msrb.mxu1 %v1748_v3  ;;  %v788_v3 = vsub.f32 %v1939_v46, %v787_v53 }
  0x47   :  { %683 = vmatpush.bf16.msrb.mxu2 %v1756_v4  ;;  %v794_v4 = vsub.f32 %v1942_v47, %v793_v54 }
  0x48   :  { %696 = vmatpush.bf16.msrb.mxu3 %v1764_v5  ;;  %v805_v5 = vand.u32 4294901760, %v1957_v55 }
  0x49   :  { %658 = vmatpush.bf16.msrb.mxu0 %v1739_v6  ;;  %v714_v6 = vld [vmem:[%s2395_s3 + $0x20] sm:$0xff] }
  0x4a   :  { %671 = vmatpush.bf16.msrb.mxu1 %v1747_v7  ;;  %v783_v7 = vand.u32 4294901760, %v782_v58 }
  0x4b   :  { %684 = vmatpush.bf16.msrb.mxu2 %v1755_v8  ;;  %v1999_v8 = vand.u32 4294901760, %v717_v62 }
  0x4c   :  { %697 = vmatpush.bf16.msrb.mxu3 %v1763_v9  ;;  %659 = vmatmul.bf16.vlgmr.msrb.gmra.mxu0 %v79_v14  ;;  %v2001_v9 = vand.u32 4294901760, %v716_v63  ;;  %v713_v14 = vld [vmem:[%s2395_s3 + $0x18] sm:$0xff] }
  0x4d   :  { %672 = vmatmul.bf16.vlgmr.msrb.gmra.mxu1 %v80_v15  ;;  %727 = vmatpush.msra.mxu0 %v1898_v28  ;;  %v789_v15 = vand.u32 4294901760, %v788_v3  ;;  %v2037_v25 = vand.u32 4294901760, %v713_v14  ;;  %v2079_v3 = vand.u32 4294901760, %v710_v56 }
  0x4e   :  { %685 = vmatmul.bf16.vlgmr.msrb.gmra.mxu2 %v81_v16  ;;  %772 = vmatpush.msra.mxu1 %v771_v1  ;;  %v2016_v16 = vsub.f32 %v717_v62, %v1999_v8 }
  0x4f   :  { %698 = vmatmul.bf16.vlgmr.msrb.gmra.mxu3 %v82_v17  ;;  %729 = vmatpush.msra.mxu0 %v1900_v29  ;;  %v2020_v17 = vsub.f32 %v716_v63, %v2001_v9  ;;  %v2067_v62 = vsub.f32 %v713_v14, %v2037_v25 }
  0x50   :  { %923 = vmatpush.msra.mxu3 %v1898_v28  ;;  %870 = vmatpush.msra.mxu2 %v1926_v42  ;;  %v1094_v42 = vld [vmem:[#allocation4 + $0x60] sm:$0xff] }
  0x51   :  { %731 = vmatpush.msra.mxu0 %v1902_v30  ;;  %778 = vmatpush.msra.mxu1 %v777_v2  ;;  %v823_v39 = vand.u32 4294901760, %v2020_v17 }
  0x52   :  { %925 = vmatpush.msra.mxu3 %v1900_v29  ;;  %873 = vmatpush.msra.mxu2 %v1929_v43  ;;  %v1093_v43 = vld [vmem:[#allocation4 + $0x58] sm:$0xff] }
  0x53   :  { %733 = vmatpush.msra.mxu0 %v1913_v36  ;;  %784 = vmatpush.msra.mxu1 %v783_v7  ;;  %v824_v1 = vsub.f32 %v2020_v17, %v823_v39 }
  0x54   :  { %927 = vmatpush.msra.mxu3 %v1902_v30  ;;  %876 = vmatpush.msra.mxu2 %v1932_v44  ;;  %v1092_v44 = vld [vmem:[#allocation4 + $0x50] sm:$0xff] }
  0x55   :  { %735 = vmatpush.msra.mxu0 %v1915_v37  ;;  %790 = vmatpush.msra.mxu1 %v789_v15 }
  0x56   :  { %929 = vmatpush.msra.mxu3 %v1913_v36  ;;  %879 = vmatpush.msra.mxu2 %v1939_v46  ;;  %v2180_v46 = vand.u32 4294901760, %v1094_v42 }
  0x57   :  { %737 = vmatpush.msra.mxu0 %v1917_v38 }
  0x58   :  { %931 = vmatpush.msra.mxu3 %v1915_v37  ;;  %882 = vmatpush.msra.mxu2 %v1942_v47  ;;  %v2182_v47 = vand.u32 4294901760, %v1093_v43 }
  0x59   :  { %739 = vmatpush.msra.mxu0 %v1935_v45 }
  0x5a   :  { %933 = vmatpush.msra.mxu3 %v1917_v38  ;;  %885 = vmatpush.msra.mxu2 %v1945_v48  ;;  %v2184_v48 = vand.u32 4294901760, %v1092_v44 }
  0x5b   :  { %741 = vmatpush.msra.mxu0 %v1947_v49 }
  0x5c   :  { %935 = vmatpush.msra.mxu3 %v1935_v45  ;;  %888 = vmatpush.msra.mxu2 %v1957_v55 }
  0x5d   :  { %743 = vmatpush.msra.mxu0 %v1999_v8 }
  0x5e   :  { %891 = vmatpush.msra.mxu2 %v1973_v61  ;;  %937 = vmatpush.msra.mxu3 %v1947_v49 }
  0x5f   :  { %745 = vmatpush.msra.mxu0 %v2001_v9 }
  0x60   :  { %894 = vmatpush.msra.mxu2 %v2016_v16  ;;  %939 = vmatpush.msra.mxu3 %v1999_v8 }
  0x61   :  { %747 = vmatpush.msra.mxu0 %v2003_v10 }
  0x62   :  { %897 = vmatpush.msra.mxu2 %v2020_v17  ;;  %941 = vmatpush.msra.mxu3 %v2001_v9 }
  0x64   :  { %943 = vmatpush.msra.mxu3 %v2003_v10 }
  0xa9   :  { %v608_v18 = vpop.f32.mrf.mxu0 }
  0xaa   :  { %v621_v19 = vpop.f32.mrf.mxu1  ;;  %v609_v34 = vadd.f32 %v1777_v24, %v608_v18  ;;  %v2022_v18 = vand.u32 4294901760, %v714_v6  ;;  %v2035_v24 = vsub.f32 %v715_v0, %v2003_v10 }
  0xac   :  { %v622_v59 = vadd.f32 %v621_v19, %v609_v34  ;;  %v712_v19 = vld [vmem:[%s2395_s3 + $0x10] sm:$0xff]  ;;  %v801_v34 = vand.u32 4294901760, %v800_v12  ;;  %v841_v12 = vand.u32 4294901760, %v2067_v62  ;;  %749 = vmatpush.msra.mxu0 %v2022_v18  ;;  %900 = vmatpush.msra.mxu2 %v2035_v24 }
  0xad   :  { %v2043_v31 = vand.u32 4294901760, %v712_v19  ;;  %945 = vmatpush.msra.mxu3 %v2022_v18 }
  0xae   :  { %751 = vmatpush.msra.mxu0 %v2037_v25 }
  0xaf   :  { %v2070_v63 = vsub.f32 %v712_v19, %v2043_v31  ;;  %947 = vmatpush.msra.mxu3 %v2037_v25 }
  0xb0   :  { %753 = vmatpush.msra.mxu0 %v2043_v31 }
  0xb1   :  { %v1882_v20 = vpop.f32.mrf.mxu2  ;;  %v610_v22 = vpop.f32.mrf.mxu0  ;;  %v847_v19 = vand.u32 4294901760, %v2070_v63  ;;  %949 = vmatpush.msra.mxu3 %v2043_v31 }
  0xb2   :  { %v1884_v21 = vpop.f32.mrf.mxu3  ;;  %v623_v23 = vpop.f32.mrf.mxu1  ;;  %v635_v11 = vadd.f32 %v1882_v20, %v622_v59  ;;  %v806_v20 = vsub.f32 %v1957_v55, %v805_v5  ;;  %v795_v22 = vand.u32 4294901760, %v794_v4  ;;  %v829_v59 = vand.u32 4294901760, %v2035_v24 }
  0xb3   :  { %v817_v23 = vand.u32 4294901760, %v2016_v16  ;;  %v2204_v55 = vsub.f32 %v1092_v44, %v2184_v48 }
  0xb4   :  { %v648_v27 = vadd.f32 %v1884_v21, %v635_v11  ;;  %v2053_v21 = vsub.f32 %v714_v6, %v2022_v18  ;;  %v807_v40 = vand.u32 4294901760, %v806_v20  ;;  %796 = vmatpush.msra.mxu1 %v795_v22  ;;  %v830_v11 = vsub.f32 %v2035_v24, %v829_v59 }
  0xb5   :  { %v818_v58 = vsub.f32 %v2016_v16, %v817_v23 }
  0xb6   :  { %802 = vmatpush.msra.mxu1 %v801_v34  ;;  %v835_v2 = vand.u32 4294901760, %v2053_v21  ;;  %903 = vmatpush.msra.mxu2 %v2053_v21 }
  0xb7   :  { %v819_v7 = vand.u32 4294901760, %v818_v58 }
  0xb8   :  { %808 = vmatpush.msra.mxu1 %v807_v40  ;;  %v842_v40 = vsub.f32 %v2067_v62, %v841_v12  ;;  %906 = vmatpush.msra.mxu2 %v2067_v62 }
  0xb9   :  { %v636_v35 = vpop.f32.mrf.mxu2 }
  0xba   :  { %v649_v41 = vpop.f32.mrf.mxu3  ;;  %v812_v35 = vsub.f32 %v1973_v61, %v811_v13  ;;  %909 = vmatpush.msra.mxu2 %v2070_v63 }
  0xbb   :  { %v2055_v41 = vand.u32 4294901760, %v711_v26 }
  0xbc   :  { %v813_v0 = vand.u32 4294901760, %v812_v35  ;;  %v831_v35 = vand.u32 4294901760, %v830_v11 }
  0xbd   :  { %v2082_v4 = vsub.f32 %v711_v26, %v2055_v41  ;;  %755 = vmatpush.msra.mxu0 %v2055_v41  ;;  %951 = vmatpush.msra.mxu3 %v2055_v41 }
  0xbe   :  { %814 = vmatpush.msra.mxu1 %v813_v0  ;;  %v848_v0 = vsub.f32 %v2070_v63, %v847_v19 }
  0xbf   :  { %757 = vmatpush.msra.mxu0 %v2079_v3  ;;  %912 = vmatpush.msra.mxu2 %v2082_v4 }
  0xc0   :  { %820 = vmatpush.msra.mxu1 %v819_v7  ;;  %953 = vmatpush.msra.mxu3 %v2079_v3 }
  0xc1   :  { %964 = vmatpush.msrb.mxu0 %v769_v50 }
  0xc3   :  { %968 = vmatpush.msrb.mxu0 %v775_v51 }
  0xc5   :  { %972 = vmatpush.msrb.mxu0 %v781_v52 }
  0xc7   :  { %976 = vmatpush.msrb.mxu0 %v787_v53  ;;  %v2198_v53 = vsub.f32 %v1094_v42, %v2180_v46 }
  0xc9   :  { %v660_v32 = vpop.f32.mrf.mxu0  ;;  %980 = vmatpush.msrb.mxu0 %v793_v54  ;;  %v2201_v54 = vsub.f32 %v1093_v43, %v2182_v47  ;;  %v1086_v43 = vld [vmem:[#allocation4 + $0x20] sm:$0xff] }
  0xca   :  { %v673_v33 = vpop.f32.mrf.mxu1  ;;  %v661_v57 = vadd.f32 %v660_v32, %v648_v27  ;;  %v825_v27 = vand.u32 4294901760, %v824_v1  ;;  %v836_v32 = vsub.f32 %v2053_v21, %v835_v2 }
  0xcb   :  { %984 = vmatpush.msrb.mxu0 %v799_v60 }
  0xcc   :  { %v674_v6 = vadd.f32 %v673_v33, %v661_v57  ;;  %v2099_v33 = vsub.f32 %v710_v56, %v2079_v3  ;;  %v853_v57 = vand.u32 4294901760, %v2082_v4  ;;  %826 = vmatpush.msra.mxu1 %v825_v27  ;;  %v837_v58 = vand.u32 4294901760, %v836_v32  ;;  %v1091_v27 = vld [vmem:[#allocation4 + $0x48] sm:$0xff] }
  0xcd   :  { %988 = vmatpush.msrb.mxu0 %v805_v5  ;;  %v2251_v32 = vand.u32 4294901760, %v1091_v27 }
  0xce   :  { %v859_v1 = vand.u32 4294901760, %v2099_v33  ;;  %832 = vmatpush.msra.mxu1 %v831_v35  ;;  %v854_v7 = vsub.f32 %v2082_v4, %v853_v57  ;;  %915 = vmatpush.msra.mxu2 %v2099_v33 }
  0xcf   :  { %992 = vmatpush.msrb.mxu0 %v811_v13 }
  0xd0   :  { %838 = vmatpush.msra.mxu1 %v837_v58 }
  0xd1   :  { %v686_v14 = vpop.f32.mrf.mxu2  ;;  %v662_v22 = vpop.f32.mrf.mxu0  ;;  %996 = vmatpush.msrb.mxu0 %v817_v23 }
  0xd2   :  { %v699_v15 = vpop.f32.mrf.mxu3  ;;  %v687_v20 = vadd.f32 %v686_v14, %v674_v6  ;;  %v675_v26 = vpop.f32.mrf.mxu1  ;;  %v843_v6 = vand.u32 4294901760, %v842_v40  ;;  %v855_v22 = vand.u32 4294901760, %v854_v7  ;;  %v1089_v40 = vld [vmem:[#allocation4 + $0x38] sm:$0xff] }
  0xd3   :  { %1000 = vmatpush.msrb.mxu0 %v823_v39  ;;  %v2264_v58 = vand.u32 4294901760, %v1089_v40 }
  0xd4   :  { %v2103_v34 = vadd.f32 %v699_v15, %v687_v20  ;;  %v849_v15 = vand.u32 4294901760, %v848_v0  ;;  %v860_v20 = vsub.f32 %v2099_v33, %v859_v1  ;;  %844 = vmatpush.msra.mxu1 %v843_v6  ;;  %v1090_v33 = vld [vmem:[#allocation4 + $0x40] sm:$0xff]  ;;  %v1088_v0 = vld [vmem:[#allocation4 + $0x30] sm:$0xff] }
  0xd5   :  { %1004 = vmatpush.msrb.mxu0 %v829_v59  ;;  %v2256_v35 = vand.u32 4294901760, %v1090_v33  ;;  %v2274_v7 = vsub.f32 %v1089_v40, %v2264_v58 }
  0xd6   :  { %v704_v56 = vsel %vm703_vm0, %v2103_v34, -inf  ;;  %850 = vmatpush.msra.mxu1 %v849_v15  ;;  %v861_v26 = vand.u32 4294901760, %v860_v20 }
  0xd7   :  { %705 = vmax.xlane.f32.xlu0 %v704_v56  ;;  %1008 = vmatpush.msrb.mxu0 %v835_v2  ;;  %v2262_v56 = vsub.f32 %v1090_v33, %v2256_v35  ;;  %v1189_v20 = vand.u32 4294901760, %v2274_v7 }
  0xd8   :  { %856 = vmatpush.msra.mxu1 %v855_v22 }
  0xd9   :  { %v688_v11 = vpop.f32.mrf.mxu2  ;;  %1012 = vmatpush.msrb.mxu0 %v841_v12  ;;  %v1183_v6 = vand.u32 4294901760, %v2262_v56 }
  0xda   :  { %v701_v14 = vpop.f32.mrf.mxu3  ;;  %862 = vmatpush.msra.mxu1 %v861_v26  ;;  %v2276_v11 = vand.u32 4294901760, %v1088_v0  ;;  %v1087_v26 = vld [vmem:[#allocation4 + $0x28] sm:$0xff] }
  0xdb   :  { %1016 = vmatpush.msrb.mxu0 %v847_v19  ;;  %v1184_v15 = vsub.f32 %v2262_v56, %v1183_v6 }
  0xdc   :  { %1031 = vmatpush.msrb.mxu1 %v1898_v28  ;;  %v1097_v28 = vld [vmem:[#allocation4 + $0x78] sm:$0xff]  ;;  %v2286_v22 = vsub.f32 %v1088_v0, %v2276_v11 }
  0xdd   :  { %1020 = vmatpush.msrb.mxu0 %v853_v57 }
  0xde   :  { %1033 = vmatpush.msrb.mxu1 %v1900_v29  ;;  %v1096_v29 = vld [vmem:[#allocation4 + $0x70] sm:$0xff]  ;;  %v1195_v42 = vand.u32 4294901760, %v2286_v22 }
  0xdf   :  { %1024 = vmatpush.msrb.mxu0 %v859_v1 }
  0xe0   :  { %1035 = vmatpush.msrb.mxu1 %v1902_v30  ;;  %v1095_v30 = vld [vmem:[#allocation4 + $0x68] sm:$0xff] }
  0xe2   :  { %1037 = vmatpush.msrb.mxu1 %v1913_v36  ;;  %v2174_v36 = vand.u32 4294901760, %v1097_v28 }
  0xe4   :  { %1039 = vmatpush.msrb.mxu1 %v1915_v37  ;;  %v2176_v37 = vand.u32 4294901760, %v1096_v29  ;;  %v2188_v50 = vsub.f32 %v1097_v28, %v2174_v36  ;;  %1099 = vmatpush.msrb.mxu2 %v2174_v36  ;;  %v2290_v28 = vand.u32 4294901760, %v1087_v26 }
  0xe6   :  { %1041 = vmatpush.msrb.mxu1 %v1917_v38  ;;  %v2178_v38 = vand.u32 4294901760, %v1095_v30  ;;  %v2191_v51 = vsub.f32 %v1096_v29, %v2176_v37  ;;  %v1141_v61 = vand.u32 4294901760, %v2188_v50  ;;  %1101 = vmatpush.msrb.mxu2 %v2176_v37  ;;  %v1185_v29 = vand.u32 4294901760, %v1184_v15 }
  0xe7   :  { %v2299_v44 = vsub.f32 %v1087_v26, %v2290_v28 }
  0xe8   :  { %1043 = vmatpush.msrb.mxu1 %v1935_v45  ;;  %v2194_v52 = vsub.f32 %v1095_v30, %v2178_v38  ;;  %v1147_v5 = vand.u32 4294901760, %v2191_v51  ;;  %v1142_v13 = vsub.f32 %v2188_v50, %v1141_v61  ;;  %1103 = vmatpush.msrb.mxu2 %v2178_v38  ;;  %v1190_v30 = vsub.f32 %v2274_v7, %v1189_v20 }
  0xea   :  { %1045 = vmatpush.msrb.mxu1 %v1947_v49  ;;  %v1148_v16 = vsub.f32 %v2191_v51, %v1147_v5  ;;  %1105 = vmatpush.msrb.mxu2 %v2180_v46 }
  0xec   :  { %1047 = vmatpush.msrb.mxu1 %v1999_v8  ;;  %v1153_v8 = vand.u32 4294901760, %v2194_v52  ;;  %v1149_v23 = vand.u32 4294901760, %v1148_v16  ;;  %1107 = vmatpush.msrb.mxu2 %v2182_v47  ;;  %v1201_v16 = vand.u32 4294901760, %v2299_v44 }
  0xee   :  { %1049 = vmatpush.msrb.mxu1 %v2001_v9  ;;  %v1159_v9 = vand.u32 4294901760, %v2198_v53  ;;  %v1154_v17 = vsub.f32 %v2194_v52, %v1153_v8  ;;  %1109 = vmatpush.msrb.mxu2 %v2184_v48 }
  0xf0   :  { %1051 = vmatpush.msrb.mxu1 %v2003_v10  ;;  %v1165_v10 = vand.u32 4294901760, %v2201_v54  ;;  %v1160_v24 = vsub.f32 %v2198_v53, %v1159_v9  ;;  %1111 = vmatpush.msrb.mxu2 %v2251_v32 }
  0xf2   :  { %1053 = vmatpush.msrb.mxu1 %v2022_v18  ;;  %v1143_v18 = vand.u32 4294901760, %v1142_v13  ;;  %v1166_v39 = vsub.f32 %v2201_v54, %v1165_v10  ;;  %1113 = vmatpush.msrb.mxu2 %v2256_v35  ;;  %v1085_v13 = vld [vmem:[#allocation4 + $0x18] sm:$0xff] }
  0xf4   :  { %1055 = vmatpush.msrb.mxu1 %v2037_v25  ;;  %v1171_v25 = vand.u32 4294901760, %v2204_v55  ;;  %1144 = vmatpush.msrb.mxu3 %v1143_v18  ;;  %v1167_v63 = vand.u32 4294901760, %v1166_v39  ;;  %v2312_v18 = vand.u32 4294901760, %v1085_v13 }
  0xf5   :  { %1115 = vmatpush.msrb.mxu2 %v2264_v58 }
  0xf6   :  { %1057 = vmatpush.msrb.mxu1 %v2043_v31  ;;  %v1155_v31 = vand.u32 4294901760, %v1154_v17  ;;  %1150 = vmatpush.msrb.mxu3 %v1149_v23  ;;  %v1172_v59 = vsub.f32 %v2204_v55, %v1171_v25 }
  0xf7   :  { %1117 = vmatpush.msrb.mxu2 %v2276_v11 }
  0xf8   :  { %1059 = vmatpush.msrb.mxu1 %v2055_v41  ;;  %v1161_v41 = vand.u32 4294901760, %v1160_v24  ;;  %1156 = vmatpush.msrb.mxu3 %v1155_v31  ;;  %v1084_v24 = vld [vmem:[#allocation4 + $0x10] sm:$0xff]  ;;  %v1202_v31 = vsub.f32 %v2299_v44, %v1201_v16 }
  0xf9   :  { %1119 = vmatpush.msrb.mxu2 %v2290_v28 }
  0xfa   :  { %1061 = vmatpush.msrb.mxu1 %v2079_v3  ;;  %1162 = vmatpush.msrb.mxu3 %v1161_v41  ;;  %v1173_v3 = vand.u32 4294901760, %v1172_v59  ;;  %v2322_v41 = vsub.f32 %v1085_v13, %v2312_v18  ;;  %v2324_v59 = vand.u32 4294901760, %v1084_v24 }
  0xfc   :  { %1168 = vmatpush.msrb.mxu3 %v1167_v63  ;;  %v1203_v63 = vand.u32 4294901760, %v1202_v31 }
  0xfe   :  { %1174 = vmatpush.msrb.mxu3 %v1173_v3  ;;  %v1213_v3 = vand.u32 4294901760, %v2322_v41 }
 0x100   :  { %v1214_v33 = vsub.f32 %v2322_v41, %v1213_v3 }
 0x14a   :  { %v706_v45 = vpop.xlane.xlu0 %705 }
 0x14b   :  { %v707_v49 = vsub.f32 %v2103_v34, %v706_v45  ;;  %v2254_v34 = vsub.f32 %v1091_v27, %v2251_v32  ;;  %v2301_v45 = vand.u32 4294901760, %v1086_v43 }
 0x14d   :  { %v708_v60 = vmul.f32 1.442695, %v707_v49  ;;  %v1177_v57 = vand.u32 4294901760, %v2254_v34  ;;  %v1191_v49 = vand.u32 4294901760, %v1190_v30  ;;  %v2310_v17 = vsub.f32 %v1086_v43, %v2301_v45  ;;  %1121 = vmatpush.msrb.mxu2 %v2301_v45 }
 0x14f   :  { %1778 = vpow2.f32 %v708_v60  ;;  %v1178_v1 = vsub.f32 %v2254_v34, %v1177_v57  ;;  %v1196_v60 = vsub.f32 %v2286_v22, %v1195_v42  ;;  %v1207_v39 = vand.u32 4294901760, %v2310_v17  ;;  %1123 = vmatpush.msrb.mxu2 %v2312_v18 }
 0x151   :  { %v1179_v14 = vand.u32 4294901760, %v1178_v1  ;;  %v1197_v23 = vand.u32 4294901760, %v1196_v60  ;;  %1125 = vmatpush.msrb.mxu2 %v2324_v59 }
 0x153   :  { %1180 = vmatpush.msrb.mxu3 %v1179_v14  ;;  %v1215_v14 = vand.u32 4294901760, %v1214_v33 }
 0x155   :  { %v2231_v21 = vpop.eup %1778  ;;  %1186 = vmatpush.msrb.mxu3 %v1185_v29 }
 0x156   :  { %v758_v62 = vand.u32 4294901760, %v2231_v21 }
 0x157   :  { %1192 = vmatpush.msrb.mxu3 %v1191_v49 }
 0x158   :  { %864 = vmatmul.f32.vlgmr.msra.gmra.mxu1 %v758_v62  ;;  %v759_v2 = vsub.f32 %v2231_v21, %v758_v62 }
 0x159   :  { %1295 = vmatpush.msra.mxu1 %v2174_v36  ;;  %1198 = vmatpush.msrb.mxu3 %v1197_v23 }
 0x15a   :  { %918 = vmatmul.f32.vlgmr.msra.gmra.mxu2 %v759_v2  ;;  %v760_v4 = vand.u32 4294901760, %v759_v2 }
 0x15b   :  { %1297 = vmatpush.msra.mxu1 %v2176_v37  ;;  %1204 = vmatpush.msrb.mxu3 %v1203_v63 }
 0x15c   :  { %957 = vmatmul.f32.vlgmr.msra.gmra.mxu3 %v760_v4  ;;  %v761_v12 = vsub.f32 %v759_v2, %v760_v4  ;;  %v1208_v2 = vsub.f32 %v2310_v17, %v1207_v39  ;;  %v1218_v4 = vsub.f32 %v1084_v24, %v2324_v59 }
 0x15d   :  { %1299 = vmatpush.msra.mxu1 %v2178_v38 }
 0x15e   :  { %v762_v19 = vand.u32 4294901760, %v761_v12  ;;  %v1209_v27 = vand.u32 4294901760, %v1208_v2  ;;  %v1219_v40 = vand.u32 4294901760, %v1218_v4 }
 0x15f   :  { %1301 = vmatpush.msra.mxu1 %v2180_v46 }
 0x160   :  { %763 = vmatmul.f32.vlgmr.msra.gmra.mxu0 %v762_v19  ;;  %1063 = vmatmul.f32.vlgmr.msrb.gmra.mxu1 %v758_v62  ;;  %v1082_v19 = vld [vmem:[#allocation4] sm:$0xff]  ;;  %v1220_v15 = vsub.f32 %v1218_v4, %v1219_v40 }
 0x161   :  { %1242 = vmatpush.msra.mxu0 %v2188_v50  ;;  %1303 = vmatpush.msra.mxu1 %v2182_v47  ;;  %v2340_v0 = vand.u32 4294901760, %v1082_v19 }
 0x162   :  { %1210 = vmatpush.msrb.mxu3 %v1209_v27  ;;  %v1221_v30 = vand.u32 4294901760, %v1220_v15 }
 0x163   :  { %1245 = vmatpush.msra.mxu0 %v2191_v51  ;;  %1305 = vmatpush.msra.mxu1 %v2184_v48  ;;  %v1230_v26 = vsub.f32 %v1082_v19, %v2340_v0 }
 0x164   :  { %1216 = vmatpush.msrb.mxu3 %v1215_v14 }
 0x165   :  { %1248 = vmatpush.msra.mxu0 %v2194_v52  ;;  %1307 = vmatpush.msra.mxu1 %v2251_v32  ;;  %v1231_v43 = vand.u32 4294901760, %v1230_v26 }
 0x166   :  { %1222 = vmatpush.msrb.mxu3 %v1221_v30 }
 0x167   :  { %1251 = vmatpush.msra.mxu0 %v2198_v53  ;;  %1309 = vmatpush.msra.mxu1 %v2256_v35  ;;  %v1232_v60 = vsub.f32 %v1230_v26, %v1231_v43 }
 0x168   :  { %1026 = vmatmul.f32.vlgmr.msrb.gmra.mxu0 %v758_v62  ;;  %v1083_v62 = vld [vmem:[#allocation4 + $0x8] sm:$0xff] }
 0x169   :  { %1254 = vmatpush.msra.mxu0 %v2201_v54  ;;  %1311 = vmatpush.msra.mxu1 %v2264_v58  ;;  %v2336_v12 = vand.u32 4294901760, %v1083_v62  ;;  %v1233_v23 = vand.u32 4294901760, %v1232_v60 }
 0x16b   :  { %1257 = vmatpush.msra.mxu0 %v2204_v55  ;;  %1313 = vmatpush.msra.mxu1 %v2276_v11  ;;  %v1224_v1 = vsub.f32 %v1083_v62, %v2336_v12 }
 0x16c   :  { %1127 = vmatpush.msrb.mxu2 %v2336_v12 }
 0x16d   :  { %1260 = vmatpush.msra.mxu0 %v2254_v34  ;;  %1315 = vmatpush.msra.mxu1 %v2290_v28  ;;  %v1225_v29 = vand.u32 4294901760, %v1224_v1 }
 0x16e   :  { %1129 = vmatpush.msrb.mxu2 %v2340_v0 }
 0x16f   :  { %1263 = vmatpush.msra.mxu0 %v2262_v56  ;;  %1317 = vmatpush.msra.mxu1 %v2301_v45  ;;  %v1226_v49 = vsub.f32 %v1224_v1, %v1225_v29 }
 0x170   :  { %1336 = vmatpush.msra.mxu2 %v1141_v61 }
 0x171   :  { %1266 = vmatpush.msra.mxu0 %v2274_v7  ;;  %1319 = vmatpush.msra.mxu1 %v2312_v18  ;;  %v1227_v13 = vand.u32 4294901760, %v1226_v49 }
 0x172   :  { %1340 = vmatpush.msra.mxu2 %v1147_v5 }
 0x173   :  { %1269 = vmatpush.msra.mxu0 %v2286_v22  ;;  %1321 = vmatpush.msra.mxu1 %v2324_v59 }
 0x174   :  { %1344 = vmatpush.msra.mxu2 %v1153_v8  ;;  %1228 = vmatpush.msrb.mxu3 %v1227_v13 }
 0x175   :  { %1272 = vmatpush.msra.mxu0 %v2299_v44  ;;  %1323 = vmatpush.msra.mxu1 %v2336_v12 }
 0x176   :  { %1348 = vmatpush.msra.mxu2 %v1159_v9  ;;  %1234 = vmatpush.msrb.mxu3 %v1233_v23 }
 0x177   :  { %1275 = vmatpush.msra.mxu0 %v2310_v17  ;;  %1325 = vmatpush.msra.mxu1 %v2340_v0 }
 0x178   :  { %1403 = vmatpush.msra.mxu3 %v2174_v36  ;;  %1352 = vmatpush.msra.mxu2 %v1165_v10 }
 0x179   :  { %1278 = vmatpush.msra.mxu0 %v2322_v41 }
 0x17a   :  { %1405 = vmatpush.msra.mxu3 %v2176_v37  ;;  %1356 = vmatpush.msra.mxu2 %v1171_v25 }
 0x17b   :  { %1281 = vmatpush.msra.mxu0 %v1218_v4 }
 0x17c   :  { %1407 = vmatpush.msra.mxu3 %v2178_v38  ;;  %1360 = vmatpush.msra.mxu2 %v1177_v57 }
 0x17d   :  { %1284 = vmatpush.msra.mxu0 %v1224_v1 }
 0x17e   :  { %1409 = vmatpush.msra.mxu3 %v2180_v46  ;;  %1364 = vmatpush.msra.mxu2 %v1183_v6 }
 0x17f   :  { %1287 = vmatpush.msra.mxu0 %v1230_v26 }
 0x180   :  { %1411 = vmatpush.msra.mxu3 %v2182_v47  ;;  %1368 = vmatpush.msra.mxu2 %v1189_v20 }
 0x182   :  { %1413 = vmatpush.msra.mxu3 %v2184_v48  ;;  %1372 = vmatpush.msra.mxu2 %v1195_v42 }
 0x184   :  { %1415 = vmatpush.msra.mxu3 %v2251_v32  ;;  %1376 = vmatpush.msra.mxu2 %v1201_v16 }
 0x186   :  { %1417 = vmatpush.msra.mxu3 %v2256_v35  ;;  %1380 = vmatpush.msra.mxu2 %v1207_v39 }
 0x188   :  { %1419 = vmatpush.msra.mxu3 %v2264_v58  ;;  %1384 = vmatpush.msra.mxu2 %v1213_v3 }
 0x18a   :  { %1421 = vmatpush.msra.mxu3 %v2276_v11  ;;  %1388 = vmatpush.msra.mxu2 %v1219_v40 }
 0x18c   :  { %1423 = vmatpush.msra.mxu3 %v2290_v28  ;;  %1392 = vmatpush.msra.mxu2 %v1225_v29 }
 0x18e   :  { %1425 = vmatpush.msra.mxu3 %v2301_v45  ;;  %1396 = vmatpush.msra.mxu2 %v1231_v43  ;;  %v1439_v45 = vlaneseq }
 0x190   :  { %1427 = vmatpush.msra.mxu3 %v2312_v18  ;;  %v1440_v18 = vand.u32 127, %v1439_v45 }
 0x192   :  { %1429 = vmatpush.msra.mxu3 %v2324_v59  ;;  %vm1441_vm5 = vcmp.lt.s32.totalorder %v1440_v18, 3 }
 0x194   :  { %1431 = vmatpush.msra.mxu3 %v2336_v12 }
 0x196   :  { %1433 = vmatpush.msra.mxu3 %v2340_v0 }
 0x1d5   :  { %v865_v36 = vpop.f32.mrf.mxu1 }
 0x1dd   :  { %v764_v37 = vpop.f32.mrf.mxu0  ;;  %v919_v46 = vpop.f32.mrf.mxu2 }
 0x1de   :  { %v866_v38 = vadd.f32 %v865_v36, %v764_v37  ;;  %v1064_v53 = vpop.f32.mrf.mxu1 }
 0x1df   :  { %v958_v48 = vpop.f32.mrf.mxu3 }
 0x1e0   :  { %v920_v47 = vadd.f32 %v919_v46, %v866_v38 }
 0x1e2   :  { %v959_v50 = vadd.f32 %v958_v48, %v920_v47 }
 0x1e5   :  { %v1027_v51 = vpop.f32.mrf.mxu0 }
 0x1e6   :  { %v1028_v52 = vadd.f32 %v1027_v51, %v959_v50 }
 0x1e8   :  { %v1065_v54 = vadd.f32 %v1064_v53, %v1028_v52 }
 0x1ea   :  { %1780 = vrcp.f32 %v1065_v54  ;;  %v1078_v8 = vand.u32 2147483648, %v1065_v54  ;;  %v1076_v10 = vand.u32 2147483647, %v1065_v54  ;;  %vm1072_vm2 = vweird.f32 %v1065_v54 }
 0x1ec   :  { %v1079_v32 = vor.u32 1.1754944e-38, %v1078_v8  ;;  %vm1077_vm4 = vcmp.eq.f32.partialorder %v1076_v10, 8.507059e+37 }
 0x1f0   :  { %v1781_v55 = vpop.eup %1780 }
 0x1f1   :  { %v1068_v61 = vmul.f32 %v1781_v55, %v1065_v54  ;;  %vm1073_vm1 = vweird.f32 %v1781_v55 }
 0x1f2   :  { %vm1074_vm3 = vmor %vm1072_vm2, %vm1073_vm1 }
 0x1f3   :  { %v1069_v5 = vsub.f32 1.0, %v1068_v61 }
 0x1f5   :  { %v1070_v9 = vmul.f32 %v1781_v55, %v1069_v5 }
 0x1f7   :  { %v1071_v25 = vadd.f32 %v1781_v55, %v1070_v9 }
 0x1f9   :  { %v1075_v34 = vsel %vm1074_vm3, %v1781_v55, %v1071_v25 }
 0x1fa   :  { %v1080_v35 = vsel %vm1077_vm4, %v1079_v32, %v1075_v34 }
 0x1fb   :  { %v1081_v57 = vmul.f32 %v2231_v21, %v1080_v35 }
 0x1fd   :  { %v1130_v56 = vand.u32 4294901760, %v1081_v57 }
 0x1ff   :  { %1236 = vmatmul.f32.vlgmr.msrb.gmra.mxu3 %v1130_v56  ;;  %v1131_v58 = vsub.f32 %v1081_v57, %v1130_v56 }
 0x201   :  { %1290 = vmatmul.f32.vlgmr.msra.gmra.mxu0 %v1131_v58  ;;  %v1132_v6 = vand.u32 4294901760, %v1131_v58 }
 0x203   :  { %1329 = vmatmul.f32.vlgmr.msra.gmra.mxu1 %v1132_v6  ;;  %v1133_v7 = vsub.f32 %v1131_v58, %v1132_v6 }
 0x205   :  { %v1134_v11 = vand.u32 4294901760, %v1133_v7 }
 0x207   :  { %1135 = vmatmul.f32.vlgmr.msrb.gmra.mxu2 %v1134_v11  ;;  %1435 = vmatmul.f32.vlgmr.msra.gmra.mxu3 %v1130_v56 }
 0x20f   :  { %1398 = vmatmul.f32.vlgmr.msra.gmra.mxu2 %v1130_v56 }
 0x27e   :  { %v1291_v42 = vpop.f32.mrf.mxu0 }
 0x280   :  { %v1330_v16 = vpop.f32.mrf.mxu1 }
 0x282   :  { %v1237_v20 = vpop.f32.mrf.mxu3 }
 0x28a   :  { %v1136_v22 = vpop.f32.mrf.mxu2  ;;  %v1436_v31 = vpop.f32.mrf.mxu3 }
 0x28b   :  { %v1238_v28 = vadd.f32 %v1237_v20, %v1136_v22 }
 0x28d   :  { %v1292_v44 = vadd.f32 %v1291_v42, %v1238_v28 }
 0x28f   :  { %v1331_v17 = vadd.f32 %v1330_v16, %v1292_v44 }
 0x292   :  { %v1399_v21 = vpop.f32.mrf.mxu2 }
 0x293   :  { %v1400_v24 = vadd.f32 %v1399_v21, %v1331_v17 }
 0x295   :  { %v1437_v39 = vadd.f32 %v1436_v31, %v1400_v24 }
 0x297   :  { %v1442_v41 = vmul.f32 %v1437_v39, %v1081_v57 }
 0x299   :  { %v1443_v59 = vsel %vm1441_vm5, %v1081_v57, %v1442_v41 }
 0x29a   :  { %1444 = vst [vmem:[%s2397_s5] sm:$0x3] %v1443_v59 }
 0x29b   :  { %1449 = vsyncpa [#allocation3], 1 }
 0x29c   :  { %1450 = vsyncpa [#allocation5], 1 }

</bundles_post_ra>
